<compile_context>
chip_gen: v7x
topology: tpu7x:2x2x1
jax: 0.10.0
libtpu: 0.0.40
codegen_flags: <defaults>
</compile_context>

<pallas_src>
import functools

import jax
import jax.numpy as jnp
from jax.experimental import pallas as pl
from jax.experimental.pallas import tpu as pltpu


# ---------------- parameter-slab layout (rows x 128 lanes, f32) ----------------
_LANES = 128
_W1_ROW = 0      # rows 0..4    : fc1 weight (5, 64)  in cols 0..63 (rows 5..7 pad)
_W2_ROW = 8      # rows 8..71   : fc2 weight (64, 128)
_W3_ROW = 136    # rows 136..263: fc3 weight (128, 64) in cols 0..63
_W4_ROW = 264    # rows 264..327: fc4 weight (64, 1)   in col 0
_B1_ROW = 392    # fc1 bias in cols 0..63
_B2_ROW = 393    # fc2 bias in cols 0..127
_B3_ROW = 394    # fc3 bias in cols 0..63
_B4_ROW = 395    # fc4 bias in col 0
_SLAB_ROWS = 400  # multiple of 8


def pack_params(params):
    """Pack (w1,b1,...,w4,b4) (weights stored (in, out)) into one lane-dense slab.

    Call ONCE at init; the forward path takes the packed slab directly.
    """
    w1, b1, w2, b2, w3, b3, w4, b4 = params
    f32 = jnp.float32
    slab = jnp.zeros((_SLAB_ROWS, _LANES), f32)
    slab = slab.at[_W1_ROW:_W1_ROW + 5, 0:64].set(w1.astype(f32))
    slab = slab.at[_W2_ROW:_W2_ROW + 64, 0:128].set(w2.astype(f32))
    slab = slab.at[_W3_ROW:_W3_ROW + 128, 0:64].set(w3.astype(f32))
    slab = slab.at[_W4_ROW:_W4_ROW + 64, 0:1].set(w4.astype(f32))
    slab = slab.at[_B1_ROW, 0:64].set(b1.reshape(-1).astype(f32))
    slab = slab.at[_B2_ROW, 0:128].set(b2.reshape(-1).astype(f32))
    slab = slab.at[_B3_ROW, 0:64].set(b3.reshape(-1).astype(f32))
    slab = slab.at[_B4_ROW, 0:1].set(b4.reshape(-1).astype(f32))
    return slab


def _plagiarism_kernel(x_ref, p_ref, out_ref):
    # x_ref: (TB, 128) -- cols [f_tok, f_ast, f_emb, bm, sm, 0-pad...], already normalized
    x = x_ref[...]

    # fc1 (in=5) as five VPU broadcast multiply-adds (no K=5 MXU pass).
    # w1 rows / b1 are zero beyond col 63, so padded lanes of h1 stay exactly 0.
    h1 = (p_ref[_B1_ROW:_B1_ROW + 1, :]
          + x[:, 0:1] * p_ref[_W1_ROW + 0:_W1_ROW + 1, :]
          + x[:, 1:2] * p_ref[_W1_ROW + 1:_W1_ROW + 2, :]
          + x[:, 2:3] * p_ref[_W1_ROW + 2:_W1_ROW + 3, :]
          + x[:, 3:4] * p_ref[_W1_ROW + 3:_W1_ROW + 4, :]
          + x[:, 4:5] * p_ref[_W1_ROW + 4:_W1_ROW + 5, :])
    h1 = jnp.maximum(h1, 0.0)                                     # (TB, 128); lanes 64.. = 0
    # dropout(p=0.3) -> identity in eval mode

    # fc2: contract over the real K=64 (half the MXU pushes vs zero-padded K=128).
    h2 = jnp.maximum(
        jnp.dot(h1[:, 0:64], p_ref[_W2_ROW:_W2_ROW + 64, :],
                preferred_element_type=jnp.float32)
        + p_ref[_B2_ROW:_B2_ROW + 1, :], 0.0)                     # (TB, 128)
    # dropout(p=0.3) -> identity in eval mode

    h3 = jnp.maximum(
        jnp.dot(h2, p_ref[_W3_ROW:_W3_ROW + 128, :],
                preferred_element_type=jnp.float32)
        + p_ref[_B3_ROW:_B3_ROW + 1, :], 0.0)                     # (TB, 128); lanes 64.. = 0

    # fc4: real K=64; output col 0 is the true logit, cols 1..127 are b4 pad (=0).
    logits = (jnp.dot(h3[:, 0:64], p_ref[_W4_ROW:_W4_ROW + 64, :],
                      preferred_element_type=jnp.float32)
              + p_ref[_B4_ROW:_B4_ROW + 1, :])                    # (TB, 128)

    # Lane-dense store: full 128-lane sigmoid (extra lanes are free EUP filler,
    # avoids vst.msk 1-lane partial stores and a narrow writeback DMA).
    out_ref[...] = jax.nn.sigmoid(logits)


def plagiarism_forward(token_sim, ast_sim, embed_sim, batch_mean_sim,
                       snippet_mean_sim, param_slab, *, max_batch_tile=2048):
    """Eval-mode forward. `param_slab` is the pre-packed output of pack_params()."""
    B, _ = token_sim.shape
    f32 = jnp.float32

    # ---- feature extraction + full-batch normalize (cheap XLA, wrapper-side) ----
    # torch.std is unbiased (ddof=1); clamp ddof at B=1 to stay finite
    # (torch itself would produce NaN there).
    def _norm_max(sim):
        m = jnp.max(sim.astype(f32), axis=-1)                     # (B,)
        mean = jnp.mean(m)
        var = jnp.sum((m - mean) ** 2) / f32(max(B - 1, 1))
        return (m - mean) / (jnp.sqrt(var) + 1e-8)

    f_tok = _norm_max(token_sim)
    f_ast = _norm_max(ast_sim)
    f_emb = _norm_max(embed_sim)
    bm = batch_mean_sim.reshape(B, 1).astype(f32)
    sm = snippet_mean_sim.reshape(B, 1).astype(f32)

    feats = jnp.concatenate(
        [f_tok[:, None], f_ast[:, None], f_emb[:, None], bm, sm], axis=-1)  # (B, 5)
    feats = jnp.pad(feats, ((0, 0), (0, _LANES - 5)))                       # (B, 128)

    # ---- batch tiling: multiple of 8; keep >= 2 grid steps when B >= 16 so both
    # TensorCores on a megacore / v7x chip get work under "parallel" semantics. ----
    TB = min(max_batch_tile, ((B + 7) // 8) * 8)
    if B >= 16 and pl.cdiv(B, TB) < 2:
        TB = ((pl.cdiv(B, 2) + 7) // 8) * 8
    Bp = pl.cdiv(B, TB) * TB
    if Bp != B:
        feats = jnp.pad(feats, ((0, Bp - B), (0, 0)))

    out = pl.pallas_call(
        _plagiarism_kernel,
        out_shape=jax.ShapeDtypeStruct((Bp, _LANES), jnp.float32),
        grid=(Bp // TB,),
        in_specs=[
            pl.BlockSpec((TB, _LANES), lambda i: (i, 0)),              # feature rows
            pl.BlockSpec(memory_space=pltpu.MemorySpace.VMEM),         # resident params
        ],
        out_specs=pl.BlockSpec((TB, _LANES), lambda i: (i, 0)),
        compiler_params=pltpu.CompilerParams(
            dimension_semantics=("parallel",),
            vmem_limit_bytes=32 * 1024 * 1024),
    )(feats, param_slab)

    return out[:B, 0:1]


def init_params(key):
    """Deterministic init for fc1..fc4; weights stored (in, out)."""
    dims = [(5, 64), (64, 128), (128, 64), (64, 1)]
    params = []
    for i, (fan_in, fan_out) in enumerate(dims):
        kw, kb = jax.random.split(jax.random.fold_in(key, i))
        bound = 1.0 / (fan_in ** 0.5)
        w = jax.random.uniform(kw, (fan_in, fan_out), jnp.float32, -bound, bound)
        b = jax.random.uniform(kb, (1, fan_out), jnp.float32, -bound, bound)
        params += [w, b]
    return tuple(params)


if __name__ == "__main__":
    key = jax.random.PRNGKey(0)
    k_tok, k_ast, k_emb, k_bm, k_sm, k_p = jax.random.split(key, 6)

    B, S = 8, 16
    token_sim = jax.random.uniform(k_tok, (B, S), jnp.float32)
    ast_sim = jax.random.uniform(k_ast, (B, S), jnp.float32)
    embed_sim = jax.random.uniform(k_emb, (B, S), jnp.float32)
    batch_mean_sim = jax.random.uniform(k_bm, (B,), jnp.float32)
    snippet_mean_sim = jax.random.uniform(k_sm, (B,), jnp.float32)

    params = init_params(k_p)
    param_slab = pack_params(params)          # packed ONCE, reused every forward

    fwd = jax.jit(functools.partial(plagiarism_forward))
    out = fwd(token_sim, ast_sim, embed_sim, batch_mean_sim,
              snippet_mean_sim, param_slab)
    out = jax.block_until_ready(out)
    assert out.shape == (B, 1)
    assert bool(jnp.all(jnp.isfinite(out)))
    assert bool(jnp.all((out >= 0.0) & (out <= 1.0)))
    print("KERNEL_OK")
</pallas_src>

<mosaic_0001>
module attributes {stable_mosaic.version = 11 : i64} {
  func.func @_plagiarism_kernel(%arg0: i32, %arg1: memref<8x128xf32, #tpu.memory_space<vmem>>, %arg2: memref<400x128xf32, #tpu.memory_space<vmem>>, %arg3: memref<8x128xf32, #tpu.memory_space<vmem>>) attributes {dimension_semantics = [#tpu.dimension_semantics<parallel>], iteration_bounds = array<i64: 1>, scalar_prefetch = 0 : i64, scratch_operands = 0 : i64, tpu.core_type = #tpu.core_type<tc>, window_params = [{transform_indices = @transform_0, window_bounds = array<i64: 8, 128>}, {pipeline_mode = #tpu.pipeline_mode<synchronous>, transform_indices = @transform_1, window_bounds = array<i64: 400, 128>}, {transform_indices = @transform_2, window_bounds = array<i64: 8, 128>}]} {
    %c0 = arith.constant 0 : index
    %c0_0 = arith.constant 0 : index
    %0 = vector.load %arg1[%c0, %c0_0] : memref<8x128xf32, #tpu.memory_space<vmem>>, vector<8x128xf32>
    %c392 = arith.constant 392 : index
    %c0_1 = arith.constant 0 : index
    %1 = vector.load %arg2[%c392, %c0_1] : memref<400x128xf32, #tpu.memory_space<vmem>>, vector<1x128xf32>
    %2 = vector.extract_strided_slice %0 {offsets = [0, 0], sizes = [8, 1], strides = [1, 1]} : vector<8x128xf32> to vector<8x1xf32>
    %c0_2 = arith.constant 0 : index
    %c0_3 = arith.constant 0 : index
    %3 = vector.load %arg2[%c0_2, %c0_3] : memref<400x128xf32, #tpu.memory_space<vmem>>, vector<1x128xf32>
    %4 = vector.broadcast %2 : vector<8x1xf32> to vector<8x128xf32>
    %5 = vector.broadcast %3 : vector<1x128xf32> to vector<8x128xf32>
    %6 = arith.mulf %4, %5 : vector<8x128xf32>
    %7 = vector.broadcast %1 : vector<1x128xf32> to vector<8x128xf32>
    %8 = arith.addf %7, %6 : vector<8x128xf32>
    %9 = vector.extract_strided_slice %0 {offsets = [0, 1], sizes = [8, 1], strides = [1, 1]} : vector<8x128xf32> to vector<8x1xf32>
    %c1 = arith.constant 1 : index
    %c0_4 = arith.constant 0 : index
    %10 = vector.load %arg2[%c1, %c0_4] : memref<400x128xf32, #tpu.memory_space<vmem>>, vector<1x128xf32>
    %11 = vector.broadcast %9 : vector<8x1xf32> to vector<8x128xf32>
    %12 = vector.broadcast %10 : vector<1x128xf32> to vector<8x128xf32>
    %13 = arith.mulf %11, %12 : vector<8x128xf32>
    %14 = arith.addf %8, %13 : vector<8x128xf32>
    %15 = vector.extract_strided_slice %0 {offsets = [0, 2], sizes = [8, 1], strides = [1, 1]} : vector<8x128xf32> to vector<8x1xf32>
    %c2 = arith.constant 2 : index
    %c0_5 = arith.constant 0 : index
    %16 = vector.load %arg2[%c2, %c0_5] : memref<400x128xf32, #tpu.memory_space<vmem>>, vector<1x128xf32>
    %17 = vector.broadcast %15 : vector<8x1xf32> to vector<8x128xf32>
    %18 = vector.broadcast %16 : vector<1x128xf32> to vector<8x128xf32>
    %19 = arith.mulf %17, %18 : vector<8x128xf32>
    %20 = arith.addf %14, %19 : vector<8x128xf32>
    %21 = vector.extract_strided_slice %0 {offsets = [0, 3], sizes = [8, 1], strides = [1, 1]} : vector<8x128xf32> to vector<8x1xf32>
    %c3 = arith.constant 3 : index
    %c0_6 = arith.constant 0 : index
    %22 = vector.load %arg2[%c3, %c0_6] : memref<400x128xf32, #tpu.memory_space<vmem>>, vector<1x128xf32>
    %23 = vector.broadcast %21 : vector<8x1xf32> to vector<8x128xf32>
    %24 = vector.broadcast %22 : vector<1x128xf32> to vector<8x128xf32>
    %25 = arith.mulf %23, %24 : vector<8x128xf32>
    %26 = arith.addf %20, %25 : vector<8x128xf32>
    %27 = vector.extract_strided_slice %0 {offsets = [0, 4], sizes = [8, 1], strides = [1, 1]} : vector<8x128xf32> to vector<8x1xf32>
    %c4 = arith.constant 4 : index
    %c0_7 = arith.constant 0 : index
    %28 = vector.load %arg2[%c4, %c0_7] : memref<400x128xf32, #tpu.memory_space<vmem>>, vector<1x128xf32>
    %29 = vector.broadcast %27 : vector<8x1xf32> to vector<8x128xf32>
    %30 = vector.broadcast %28 : vector<1x128xf32> to vector<8x128xf32>
    %31 = arith.mulf %29, %30 : vector<8x128xf32>
    %32 = arith.addf %26, %31 : vector<8x128xf32>
    %cst = arith.constant 0.000000e+00 : f32
    %33 = vector.broadcast %cst : f32 to vector<8x128xf32>
    %34 = arith.maximumf %32, %33 : vector<8x128xf32>
    %35 = vector.extract_strided_slice %34 {offsets = [0, 0], sizes = [8, 64], strides = [1, 1]} : vector<8x128xf32> to vector<8x64xf32>
    %c8 = arith.constant 8 : index
    %c0_8 = arith.constant 0 : index
    %36 = vector.load %arg2[%c8, %c0_8] : memref<400x128xf32, #tpu.memory_space<vmem>>, vector<64x128xf32>
    %cst_9 = arith.constant dense<0.000000e+00> : vector<8x128xf32>
    %37 = tpu.matmul %35, %36, %cst_9 {dimension_numbers = #tpu.dot_dimension_numbers<[1], [0], [0], [1], [0, 0, 1, 1], [], []>} : vector<8x64xf32>, vector<64x128xf32>, vector<8x128xf32> -> vector<8x128xf32>
    %c393 = arith.constant 393 : index
    %c0_10 = arith.constant 0 : index
    %38 = vector.load %arg2[%c393, %c0_10] : memref<400x128xf32, #tpu.memory_space<vmem>>, vector<1x128xf32>
    %39 = vector.broadcast %38 : vector<1x128xf32> to vector<8x128xf32>
    %40 = arith.addf %37, %39 : vector<8x128xf32>
    %cst_11 = arith.constant 0.000000e+00 : f32
    %41 = vector.broadcast %cst_11 : f32 to vector<8x128xf32>
    %42 = arith.maximumf %40, %41 : vector<8x128xf32>
    %c136 = arith.constant 136 : index
    %c0_12 = arith.constant 0 : index
    %43 = vector.load %arg2[%c136, %c0_12] : memref<400x128xf32, #tpu.memory_space<vmem>>, vector<128x128xf32>
    %cst_13 = arith.constant dense<0.000000e+00> : vector<8x128xf32>
    %44 = tpu.matmul %42, %43, %cst_13 {dimension_numbers = #tpu.dot_dimension_numbers<[1], [0], [0], [1], [0, 0, 1, 1], [], []>} : vector<8x128xf32>, vector<128x128xf32>, vector<8x128xf32> -> vector<8x128xf32>
    %c394 = arith.constant 394 : index
    %c0_14 = arith.constant 0 : index
    %45 = vector.load %arg2[%c394, %c0_14] : memref<400x128xf32, #tpu.memory_space<vmem>>, vector<1x128xf32>
    %46 = vector.broadcast %45 : vector<1x128xf32> to vector<8x128xf32>
    %47 = arith.addf %44, %46 : vector<8x128xf32>
    %cst_15 = arith.constant 0.000000e+00 : f32
    %48 = vector.broadcast %cst_15 : f32 to vector<8x128xf32>
    %49 = arith.maximumf %47, %48 : vector<8x128xf32>
    %50 = vector.extract_strided_slice %49 {offsets = [0, 0], sizes = [8, 64], strides = [1, 1]} : vector<8x128xf32> to vector<8x64xf32>
    %c264 = arith.constant 264 : index
    %c0_16 = arith.constant 0 : index
    %51 = vector.load %arg2[%c264, %c0_16] : memref<400x128xf32, #tpu.memory_space<vmem>>, vector<64x128xf32>
    %cst_17 = arith.constant dense<0.000000e+00> : vector<8x128xf32>
    %52 = tpu.matmul %50, %51, %cst_17 {dimension_numbers = #tpu.dot_dimension_numbers<[1], [0], [0], [1], [0, 0, 1, 1], [], []>} : vector<8x64xf32>, vector<64x128xf32>, vector<8x128xf32> -> vector<8x128xf32>
    %c395 = arith.constant 395 : index
    %c0_18 = arith.constant 0 : index
    %53 = vector.load %arg2[%c395, %c0_18] : memref<400x128xf32, #tpu.memory_space<vmem>>, vector<1x128xf32>
    %54 = vector.broadcast %53 : vector<1x128xf32> to vector<8x128xf32>
    %55 = arith.addf %52, %54 : vector<8x128xf32>
    %56 = arith.negf %55 : vector<8x128xf32>
    %57 = math.exp %56 : vector<8x128xf32>
    %cst_19 = arith.constant 1.000000e+00 : f32
    %58 = vector.broadcast %cst_19 : f32 to vector<8x128xf32>
    %59 = arith.addf %58, %57 : vector<8x128xf32>
    %60 = arith.divf %58, %59 : vector<8x128xf32>
    %c0_20 = arith.constant 0 : index
    %c0_21 = arith.constant 0 : index
    %61 = vector.load %arg3[%c0_20, %c0_21] : memref<8x128xf32, #tpu.memory_space<vmem>>, vector<8x128xf32>
    tpu.vector_store %arg3[%c0_20, %c0_21], %60 {strides = array<i32>} : memref<8x128xf32, #tpu.memory_space<vmem>>, vector<8x128xf32>,
    return
  }
  func.func @transform_0(%arg0: i32) -> (i32, i32) {
    %c0_i32 = arith.constant 0 : i32
    %c0_i32_0 = arith.constant 0 : i32
    return %arg0, %c0_i32 : i32, i32
  }
  func.func @transform_1(%arg0: i32) -> (i32, i32) {
    %c0_i32 = arith.constant 0 : i32
    %c0_i32_0 = arith.constant 0 : i32
    %c0_i32_1 = arith.constant 0 : i32
    return %c0_i32, %c0_i32_0 : i32, i32
  }
  func.func @transform_2(%arg0: i32) -> (i32, i32) {
    %c0_i32 = arith.constant 0 : i32
    %c0_i32_0 = arith.constant 0 : i32
    return %arg0, %c0_i32 : i32, i32
  }
}

</mosaic_0001>

<bundles_post_ra>
// kernel: plagiarism_forward.1
= control target key start
LH: loop header
LB: loop body
LE: loop exit
PB: predicated region body
PF: predicated region fallthrough
CT: control target
= control target key end

     0   :  { %7 = vsyncpa [#allocation3], 0  ;;  %s579_s9 = smov [#allocation2]   ;;  %s647_s0 = inlined_call_operand.vmem [shape: f32[8,128], index: 0, kind: input, shape index: {}]   ;;  %s648_s1 = inlined_call_operand.hbm [shape: f32[400,128], index: 1, kind: input, shape index: {}]   ;;  %s649_s2 = inlined_call_operand.vmem [shape: f32[8,128], index: 2, kind: output, shape index: {}]  }
   0x1   :  { %s15_s10 = sshll.u32 %s579_s9, 4  ;;  %s555_s13 = scalar_lea.hbm %s648_s1, 6400  ;;  %s16_s10 = int_to_ptr.vmem [resolvable:$true] %s15_s10 }
   0x2   :  { %p556_p0 = scmp.ne.s32.totalorder %s648_s1, %s555_s13  ;;  %p559_p1 = scmp.lt.u32.totalorder %s555_s13, %s648_s1 }
   0x4   :  { %p561_p2 = pnand %p559_p1, %p556_p0 }
   0x6   :  { %564 = shalt.err (!%p561_p2)
}
   0x7   :  { %s565_s18 = scalar_lea.vmem %s16_s10, 6400  ;;  %p570_p4 = scmp.lt.s32.totalorder %s16_s10, %s16_s10 }
   0x8   :  { %p566_p3 = scmp.ne.s32.totalorder %s16_s10, %s565_s18  ;;  %p571_p5 = scmp.lt.s32.totalorder %s565_s18, %s565_s18 }
   0xa   :  { %p572_p6 = por %p571_p5, %p570_p4 }
   0xc   :  { %p573_p7 = pnand %p572_p6, %p566_p3 }
   0xe   :  { %576 = shalt.err (!%p573_p7)
}
   0xf   :  { %s580_s19 = smov 128   ;;  %s581_s20 = smov 8  }
  0x10   :  { %21 = dma.hbm_to_vmem [thread:$0]  %s648_s1, 6400, %s16_s10, [#allocation3], %s580_s19, %s580_s19, %s581_s20  }
  0x11   :  { %577 = dma.done.wait [#allocation3], 6400  }
  0x12   :  { %578 = vsyncadd [#allocation3], 4294960896  ;;  %v582_v0 = vmov 0   ;;  %v583_v1 = vmov 2   ;;  %v25_v2 = vld [vmem:[%s647_s0] sm:$0xff]  ;;  %v88_v3 = vld [vmem:[#allocation2 + $0x8] sm:$0xff] }
  0x13   :  { %545 = vset.pattern.permute.xlu0 %v582_v0  ;;  %547 = vset.pattern.permute.xlu1 %v583_v1  ;;  %v89_v4 = vld [vmem:[#allocation2 + $0x10] sm:$0xff]  ;;  %v584_v5 = vmov 0.0|0.0   ;;  %v90_v7 = vld [vmem:[#allocation2 + $0x18] sm:$0xff]  ;;  %v91_v8 = vld [vmem:[#allocation2 + $0x20] sm:$0xff]  ;;  %v585_v9 = vmov 1   ;;  %v586_v10 = vmov 3  }
  0x14   :  { %30 = vperm.xlu0 %545, %v25_v2   ;;  %56 = vperm.xlu1 %547, %v25_v2   ;;  %v487_v6 = vpack.c.bf16 %v89_v4, %v88_v3  ;;  %v490_v11 = vpack.c.bf16 %v91_v8, %v90_v7  ;;  %v92_v12 = vld [vmem:[#allocation2 + $0x28] sm:$0xff]  ;;  %v93_v13 = vld [vmem:[#allocation2 + $0x30] sm:$0xff]  ;;  %v587_v15 = vmov 4   ;;  %v94_v16 = vld [vmem:[#allocation2 + $0x38] sm:$0xff]  ;;  %vm588_vm0 = vmmov 0  }
  0x15   :  { %486 = vmatprep.subr.bf16.mxu0 %v584_v5  ;;  %498 = vmatprep.subr.bf16.mxu1 %v584_v5  ;;  %v493_v14 = vpack.c.bf16 %v93_v13, %v92_v12  ;;  %v95_v17 = vld [vmem:[#allocation2 + $0x40] sm:$0xff]  ;;  %v589_v19 = vmov 0.0   ;;  %v176_v20 = vld [vmem:[#allocation2 + $0x88] sm:$0xff]  ;;  %v177_v21 = vld [vmem:[#allocation2 + $0x90] sm:$0xff]  ;;  %vm101_vm1 = vcmask 523264  }
  0x16   :  { %488 = vmatpush3.bf16.msra.mxu0 %v487_v6  ;;  %v496_v18 = vpack.c.bf16 %v95_v17, %v94_v16  ;;  %429 = vmatprep.mubr.msk.f32.mxu0 %vm588_vm0, %v589_v19  ;;  %v178_v22 = vld [vmem:[#allocation2 + $0x98] sm:$0xff]  ;;  %v499_v23 = vpack.c.bf16 %v177_v21, %v176_v20  ;;  %v179_v24 = vld [vmem:[#allocation2 + $0xa0] sm:$0xff]  ;;  %v180_v26 = vld [vmem:[#allocation2 + $0xa8] sm:$0xff] }
  0x17   :  { %489 = vmatprep.subr.bf16.mxu0 %v584_v5  ;;  %464 = vmatprep.mubr.msk.f32.mxu1 %vm588_vm0, %v589_v19  ;;  %v502_v25 = vpack.c.bf16 %v179_v24, %v178_v22  ;;  %v181_v27 = vld [vmem:[#allocation2 + $0xb0] sm:$0xff]  ;;  %v182_v29 = vld [vmem:[#allocation2 + $0xb8] sm:$0xff]  ;;  %v183_v30 = vld [vmem:[#allocation2 + $0xc0] sm:$0xff] }
  0x18   :  { %546 = vset.pattern.permute.xlu0 %v585_v9  ;;  %548 = vset.pattern.permute.xlu1 %v586_v10  ;;  %v505_v28 = vpack.c.bf16 %v181_v27, %v180_v26  ;;  %v508_v31 = vpack.c.bf16 %v183_v30, %v182_v29  ;;  %v184_v32 = vld [vmem:[#allocation2 + $0xc8] sm:$0xff]  ;;  %v185_v33 = vld [vmem:[#allocation2 + $0xd0] sm:$0xff]  ;;  %v186_v35 = vld [vmem:[#allocation2 + $0xd8] sm:$0xff] }
  0x19   :  { %45 = vperm.xlu0 %546, %v25_v2   ;;  %67 = vperm.xlu1 %548, %v25_v2   ;;  %v511_v34 = vpack.c.bf16 %v185_v33, %v184_v32  ;;  %v187_v36 = vld [vmem:[#allocation2 + $0xe0] sm:$0xff]  ;;  %v188_v38 = vld [vmem:[#allocation2 + $0xe8] sm:$0xff]  ;;  %v189_v39 = vld [vmem:[#allocation2 + $0xf0] sm:$0xff] }
  0x1a   :  { %491 = vmatpush3.bf16.msra.mxu0 %v490_v11  ;;  %500 = vmatpush3.bf16.msra.mxu1 %v499_v23  ;;  %v514_v37 = vpack.c.bf16 %v187_v36, %v186_v35  ;;  %v517_v40 = vpack.c.bf16 %v189_v39, %v188_v38  ;;  %v366_v41 = vld [vmem:[#allocation2] ss:$0 sm:$0xff]  ;;  %v367_v45 = vld [vmem:[#allocation2 + $0x188] ss:$0 sm:$0xff]  ;;  %v368_v46 = vld [vmem:[#allocation2 + $0x1] ss:$0 sm:$0xff] }
  0x1b   :  { %492 = vmatprep.subr.bf16.mxu0 %v584_v5  ;;  %501 = vmatprep.subr.bf16.mxu1 %v584_v5  ;;  %v369_v47 = vld [vmem:[#allocation2 + $0x2] ss:$0 sm:$0xff]  ;;  %v370_v52 = vld [vmem:[#allocation2 + $0x3] ss:$0 sm:$0xff]  ;;  %v371_v55 = vld [vmem:[#allocation2 + $0x4] ss:$0 sm:$0xff] }
  0x1c   :  { %v190_v63 = vld [vmem:[#allocation2 + $0xf8] sm:$0xff]  ;;  %v191_v0 = vld [vmem:[#allocation2 + $0x100] sm:$0xff]  ;;  %v269_v3 = vld [vmem:[#allocation2 + $0x110] sm:$0xff] }
  0x1d   :  { %549 = vset.pattern.permute.xlu1 %v587_v15  ;;  %550 = vset.pattern.permute.xlu0 %v587_v15  ;;  %v520_v1 = vpack.c.bf16 %v191_v0, %v190_v63  ;;  %v270_v4 = vld [vmem:[#allocation2 + $0x118] sm:$0xff]  ;;  %v271_v7 = vld [vmem:[#allocation2 + $0x120] sm:$0xff]  ;;  %v272_v9 = vld [vmem:[#allocation2 + $0x128] sm:$0xff] }
  0x1e   :  { %78 = vperm.xlu1 %549, %v25_v2   ;;  %494 = vmatpush3.bf16.msra.mxu0 %v493_v14  ;;  %v268_v2 = vld [vmem:[#allocation2 + $0x108] sm:$0xff]  ;;  %v526_v8 = vpack.c.bf16 %v271_v7, %v270_v4  ;;  %v273_v10 = vld [vmem:[#allocation2 + $0x130] sm:$0xff]  ;;  %v274_v17 = vld [vmem:[#allocation2 + $0x138] sm:$0xff] }
  0x1f   :  { %495 = vmatprep.subr.bf16.mxu0 %v584_v5  ;;  %503 = vmatpush3.bf16.msra.mxu1 %v502_v25  ;;  %v523_v6 = vpack.c.bf16 %v269_v3, %v268_v2  ;;  %v529_v11 = vpack.c.bf16 %v273_v10, %v272_v9  ;;  %v372_v12 = vld [vmem:[#allocation2 + $0x189] ss:$0 sm:$0xff]  ;;  %v374_v20 = vld [vmem:[#allocation2 + $0x18a] ss:$0 sm:$0xff]  ;;  %v375_v25 = vld [vmem:[#allocation2 + $0x18b] ss:$0 sm:$0xff] }
  0x20   :  { %504 = vmatprep.subr.bf16.mxu1 %v584_v5 }
  0x22   :  { %497 = vmatpush3.bf16.msra.mxu0 %v496_v18  ;;  %v275_v18 = vld [vmem:[#allocation2 + $0x140] sm:$0xff] }
  0x23   :  { %522 = vmatprep.subr.bf16.mxu0 %v584_v5  ;;  %506 = vmatpush3.bf16.msra.mxu1 %v505_v28 }
  0x24   :  { %507 = vmatprep.subr.bf16.mxu1 %v584_v5 }
  0x27   :  { %509 = vmatpush3.bf16.msra.mxu1 %v508_v31 }
  0x28   :  { %510 = vmatprep.subr.bf16.mxu1 %v584_v5 }
  0x2b   :  { %512 = vmatpush3.bf16.msra.mxu1 %v511_v34 }
  0x2c   :  { %513 = vmatprep.subr.bf16.mxu1 %v584_v5 }
  0x2f   :  { %515 = vmatpush3.bf16.msra.mxu1 %v514_v37 }
  0x30   :  { %516 = vmatprep.subr.bf16.mxu1 %v584_v5 }
  0x33   :  { %518 = vmatpush3.bf16.msra.mxu1 %v517_v40 }
  0x34   :  { %519 = vmatprep.subr.bf16.mxu1 %v584_v5 }
  0x37   :  { %521 = vmatpush3.bf16.msra.mxu1 %v520_v1 }
  0x93   :  { %v31_v42 = vpop.permute.xlu0 %30  ;;  %v57_v43 = vpop.permute.xlu1 %56 }
  0x94   :  { %v37_v44 = vmul.f32 %v366_v41, %v31_v42  ;;  %v63_v53 = vmul.f32 %v369_v47, %v57_v43 }
  0x96   :  { %v42_v50 = vadd.f32 %v367_v45, %v37_v44 }
  0x98   :  { %v46_v48 = vpop.permute.xlu0 %45  ;;  %v68_v49 = vpop.permute.xlu1 %67 }
  0x99   :  { %v52_v51 = vmul.f32 %v368_v46, %v46_v48  ;;  %v74_v57 = vmul.f32 %v370_v52, %v68_v49 }
  0x9b   :  { %v53_v54 = vadd.f32 %v52_v51, %v42_v50 }
  0x9d   :  { %v64_v56 = vadd.f32 %v63_v53, %v53_v54  ;;  %v79_v58 = vpop.permute.xlu1 %78 }
  0x9e   :  { %v85_v59 = vmul.f32 %v371_v55, %v79_v58 }
  0x9f   :  { %v75_v60 = vadd.f32 %v74_v57, %v64_v56 }
  0xa1   :  { %v86_v61 = vadd.f32 %v85_v59, %v75_v60 }
  0xa3   :  { %v87_v62 = vmax.f32 %v86_v61, 0.0 }
  0xa5   :  { %430 = vmatmul.mubr.msk.f32.vlgmr.msra.gmra.mrb[0].mxu0 %vm101_vm1, %v87_v62 }
  0xa6   :  { %483 = vmatprep.mubr.msk.f32.mxu0 %vm588_vm0, %v589_v19  ;;  %524 = vmatpush3.bf16.msra.mxu0 %v523_v6  ;;  %v532_v19 = vpack.c.bf16 %v275_v18, %v274_v17 }
  0xa7   :  { %525 = vmatprep.subr.bf16.mxu0 %v584_v5 }
  0xaa   :  { %527 = vmatpush3.bf16.msra.mxu0 %v526_v8 }
  0xab   :  { %528 = vmatprep.subr.bf16.mxu0 %v584_v5 }
  0xae   :  { %530 = vmatpush3.bf16.msra.mxu0 %v529_v11 }
  0xaf   :  { %531 = vmatprep.subr.bf16.mxu0 %v584_v5 }
  0xb2   :  { %533 = vmatpush3.bf16.msra.mxu0 %v532_v19 }
 0x178   :  { %v171_v13 = vpop.f32.mrb[0].mxu0 }
 0x179   :  { %v172_v14 = vadd.f32 %v372_v12, %v171_v13  ;;  %v431_v15 = vpop.f32.mrb[1].mxu0 }
 0x17b   :  { %v175_v16 = vmax.f32 %v172_v14, 0.0 }
 0x17d   :  { %465 = vmatmul.mubr.f32.vlgmr.msra.gmra.mrb[0].mxu1 %v175_v16 }
 0x250   :  { %v263_v21 = vpop.f32.mrb[0].mxu1 }
 0x251   :  { %v264_v22 = vadd.f32 %v374_v20, %v263_v21  ;;  %v466_v23 = vpop.f32.mrb[1].mxu1 }
 0x253   :  { %v267_v24 = vmax.f32 %v264_v22, 0.0 }
 0x255   :  { %484 = vmatmul.mubr.msk.f32.vlgmr.msra.gmra.mrb[2].mxu0 %vm101_vm1, %v267_v24 }
 0x328   :  { %v350_v26 = vpop.f32.mrb[2].mxu0 }
 0x329   :  { %v351_v5 = vadd.f32 %v375_v25, %v350_v26  ;;  %v485_v27 = vpop.f32.mrb[3].mxu0 }
 0x32b   :  { %v377_v28 = vmul.f32 -1.442695, %v351_v5 }
 0x32d   :  { %551 = vpow2.f32 %v377_v28 }
 0x337   :  { %v552_v29 = vpop.eup %551 }
 0x338   :  { %v357_v30 = vadd.f32 1.0, %v552_v29 }
 0x33a   :  { %553 = vrcp.f32 %v357_v30 }
 0x344   :  { %v554_v31 = vpop.eup %553 }
 0x345   :  { %360 = vst [vmem:[%s649_s2] sm:$0xff] %v554_v31 }
 0x346   :  { %365 = vsyncpa [#allocation3], 1 }

</bundles_post_ra>
